<compile_context>
chip_gen: v6e
topology: v6e:2x2x1
jax: 0.10.0
libtpu: 0.0.40
codegen_flags: <defaults>
</compile_context>

<pallas_src>
import functools

import jax
import jax.numpy as jnp
from jax.experimental import pallas as pl
from jax.experimental.pallas import tpu as pltpu

D_IN, D_H1, D_H2, D_OUT = 3, 60, 210, 1

# MXU is natively bf16 on every TPU generation we target; f32 operands would force
# the slow multi-pass MXU path (especially on v5e). Accumulation stays f32.
_MXU_DTYPE = jnp.bfloat16


def _act_dtype():
    """bf16 activations (bias-add + tanh) on v6e/v7x; f32 on v5e/older (no bf16 VPU/EUP)."""
    try:
        kind = jax.devices()[0].device_kind.lower()
    except Exception:
        return jnp.float32
    if ("v6" in kind) or ("v7" in kind):
        return jnp.bfloat16
    return jnp.float32


def _mlp_kernel(x_ref, w1_ref, b1_ref, w2_ref, b2_ref, w3_ref, b3_ref, o_ref,
                *, act_dtype):
    # x_ref: (3, TM) f32   w1: (60, 3) bf16   w2: (210, 60) bf16
    # w3: (210, 1) f32 column   biases: (·, 1) f32   o_ref: (1, TM) f32
    xT = x_ref[...].astype(_MXU_DTYPE)                                        # (3, TM)

    # Layer 1: MXU (bf16 operands, f32 accumulate) + bias + tanh.
    z1 = jnp.dot(w1_ref[...], xT, preferred_element_type=jnp.float32) + b1_ref[...]
    h1 = jnp.tanh(z1.astype(act_dtype))                                       # (60, TM)

    # Layer 2: MXU (bf16 operands, f32 accumulate) + bias + tanh.
    z2 = jnp.dot(w2_ref[...], h1.astype(_MXU_DTYPE),
                 preferred_element_type=jnp.float32) + b2_ref[...]
    h2 = jnp.tanh(z2.astype(act_dtype))                                       # (210, TM)

    # Layer 3: out_features == 1, so keep it off the MXU. VPU multiply by the f32
    # weight column (product promotes to f32) + sublane reduce, accumulated in f32.
    y = jnp.sum(w3_ref[...] * h2, axis=0, keepdims=True) + b3_ref[...]        # (1, TM)
    o_ref[...] = y.astype(o_ref.dtype)


def l3_forward(x, params, *, tm=4096, min_steps=2):
    """x: (N, 3) float32. params in native PyTorch layout: w(out,in), b(out,)."""
    w1, b1, w2, b2, w3, b3 = params
    n = x.shape[0]

    # Batch tile: multiple of 128 (lane width), capped at `tm`. When the batch allows,
    # force at least `min_steps` grid steps so the "parallel" batch axis can shard
    # across both TensorCores on v7x (harmless elsewhere: ~0.35us extra step cost).
    n128 = pl.cdiv(n, 128) * 128
    tile = min(tm, n128)
    cap = (n128 // max(min_steps, 1)) // 128 * 128
    if cap >= 128:
        tile = min(tile, cap)
    n_pad = pl.cdiv(n, tile) * tile
    grid = (n_pad // tile,)

    act_dtype = _act_dtype()

    # Batch-on-lanes input (3, N_pad): one fusable transpose+pad, no separate zero-fill
    # + dynamic-update-slice relayout. Padding columns are sliced off at the end.
    xT = jnp.pad(x.astype(jnp.float32).T, ((0, 0), (0, n_pad - n)))

    # Weights pre-cast to the MXU dtype (no per-grid-step in-kernel cast); layer-3
    # weight as an f32 column for the VPU/XLU reduction; biases as f32 columns so
    # they broadcast across the lane (batch) dimension.
    w1c = w1.astype(_MXU_DTYPE)
    w2c = w2.astype(_MXU_DTYPE)
    w3c = w3.reshape(D_H2, 1).astype(jnp.float32)
    b1c = b1.reshape(D_H1, 1).astype(jnp.float32)
    b2c = b2.reshape(D_H2, 1).astype(jnp.float32)
    b3c = b3.reshape(D_OUT, 1).astype(jnp.float32)

    full = lambda a: pl.BlockSpec(a.shape, lambda i: (0, 0))

    flops = 2 * n_pad * (D_IN * D_H1 + D_H1 * D_H2 + D_H2 * D_OUT)
    transcendentals = n_pad * (D_H1 + D_H2)
    weight_bytes = (2 * (D_IN * D_H1 + D_H1 * D_H2)          # bf16 w1, w2
                    + 4 * (D_H2 * D_OUT + D_H1 + D_H2 + D_OUT))  # f32 w3 col + biases
    bytes_accessed = 4 * n_pad * (D_IN + D_OUT) + weight_bytes

    out = pl.pallas_call(
        functools.partial(_mlp_kernel, act_dtype=act_dtype),
        out_shape=jax.ShapeDtypeStruct((D_OUT, n_pad), jnp.float32),
        grid=grid,
        in_specs=[
            pl.BlockSpec((D_IN, tile), lambda i: (0, i)),   # x streams in per tile
            full(w1c), full(b1c), full(w2c), full(b2c), full(w3c), full(b3c),
        ],
        out_specs=pl.BlockSpec((D_OUT, tile), lambda i: (0, i)),
        compiler_params=pltpu.CompilerParams(
            dimension_semantics=("parallel",),
        ),
        cost_estimate=pl.CostEstimate(
            flops=flops,
            transcendentals=transcendentals,
            bytes_accessed=bytes_accessed,
        ),
    )(xT, w1c, b1c, w2c, b2c, w3c, b3c)

    # (1, N_pad) -> (N, 1), dropping padding columns.
    return out[0, :n].reshape(n, 1)


def init_params(key):
    # Deterministic synthetic init (uniform +-1/sqrt(fan_in), like nn.Linear default),
    # stored in native PyTorch layout: W (out_features, in_features), b (out_features,).
    k1, k2, k3, k4, k5, k6 = jax.random.split(key, 6)

    def lin(kw, kb, fan_in, fan_out):
        bound = 1.0 / jnp.sqrt(float(fan_in))
        w = jax.random.uniform(kw, (fan_out, fan_in), jnp.float32, -bound, bound)
        b = jax.random.uniform(kb, (fan_out,), jnp.float32, -bound, bound)
        return w, b

    w1, b1 = lin(k1, k2, D_IN, D_H1)
    w2, b2 = lin(k3, k4, D_H1, D_H2)
    w3, b3 = lin(k5, k6, D_H2, D_OUT)
    return (w1, b1, w2, b2, w3, b3)


def reference_forward(x, params):
    w1, b1, w2, b2, w3, b3 = params
    h1 = jnp.tanh(x @ w1.T + b1)
    h2 = jnp.tanh(h1 @ w2.T + b2)
    return h2 @ w3.T + b3


if __name__ == "__main__":
    key = jax.random.PRNGKey(0)
    kx, kp = jax.random.split(key)

    params = init_params(kp)

    # Jit the wrapper so the transpose/pad/cast prep fuses and dispatch overhead is
    # a single call per batch size.
    fwd = jax.jit(l3_forward, static_argnames=("tm", "min_steps"))

    # Small batch (single grid step) and a larger batch exercising multiple grid
    # steps plus batch padding.
    for n in (8, 2500):
        kx, sub = jax.random.split(kx)
        x = jax.random.normal(sub, (n, D_IN), dtype=jnp.float32)

        out = jax.block_until_ready(fwd(x, params))
        ref = reference_forward(x, params)

        assert out.shape == (n, 1), out.shape
        err = float(jnp.max(jnp.abs(out - ref)))
        # bf16 MXU operands (all chips) + bf16 activations (v6e/v7x): loosened
        # tolerance vs the f32 reference.
        tol = 1e-1 * max(1.0, float(jnp.max(jnp.abs(ref))))
        assert err < tol, (err, tol)

    print("KERNEL_OK")
</pallas_src>

<mosaic_0001>
module attributes {stable_mosaic.version = 11 : i64} {
  func.func @_mlp_kernel(%arg0: i32, %arg1: memref<3x128xf32, #tpu.memory_space<vmem>>, %arg2: memref<60x3xbf16, #tpu.memory_space<vmem>>, %arg3: memref<60x1xf32, #tpu.memory_space<vmem>>, %arg4: memref<210x60xbf16, #tpu.memory_space<vmem>>, %arg5: memref<210x1xf32, #tpu.memory_space<vmem>>, %arg6: memref<210x1xf32, #tpu.memory_space<vmem>>, %arg7: memref<1x1xf32, #tpu.memory_space<vmem>>, %arg8: memref<1x128xf32, #tpu.memory_space<vmem>>) attributes {dimension_semantics = [#tpu.dimension_semantics<parallel>], iteration_bounds = array<i64: 1>, scalar_prefetch = 0 : i64, scratch_operands = 0 : i64, tpu.core_type = #tpu.core_type<tc>, window_params = [{transform_indices = @transform_0, window_bounds = array<i64: 3, 128>}, {pipeline_mode = #tpu.pipeline_mode<synchronous>, transform_indices = @transform_1, window_bounds = array<i64: 60, 3>}, {pipeline_mode = #tpu.pipeline_mode<synchronous>, transform_indices = @transform_2, window_bounds = array<i64: 60, 1>}, {pipeline_mode = #tpu.pipeline_mode<synchronous>, transform_indices = @transform_3, window_bounds = array<i64: 210, 60>}, {pipeline_mode = #tpu.pipeline_mode<synchronous>, transform_indices = @transform_4, window_bounds = array<i64: 210, 1>}, {pipeline_mode = #tpu.pipeline_mode<synchronous>, transform_indices = @transform_5, window_bounds = array<i64: 210, 1>}, {pipeline_mode = #tpu.pipeline_mode<synchronous>, transform_indices = @transform_6, window_bounds = array<i64: 1, 1>}, {transform_indices = @transform_7, window_bounds = array<i64: 1, 128>}]} {
    %c0 = arith.constant 0 : index
    %c0_0 = arith.constant 0 : index
    %0 = vector.load %arg1[%c0, %c0_0] : memref<3x128xf32, #tpu.memory_space<vmem>>, vector<3x128xf32>
    %1 = arith.truncf %0 : vector<3x128xf32> to vector<3x128xbf16>
    %c0_1 = arith.constant 0 : index
    %c0_2 = arith.constant 0 : index
    %2 = vector.load %arg2[%c0_1, %c0_2] : memref<60x3xbf16, #tpu.memory_space<vmem>>, vector<60x3xbf16>
    %cst = arith.constant dense<0.000000e+00> : vector<60x128xf32>
    %3 = tpu.matmul %2, %1, %cst {dimension_numbers = #tpu.dot_dimension_numbers<[1], [0], [0], [1], [0, 0, 1, 1], [], []>} : vector<60x3xbf16>, vector<3x128xbf16>, vector<60x128xf32> -> vector<60x128xf32>
    %c0_3 = arith.constant 0 : index
    %c0_4 = arith.constant 0 : index
    %4 = vector.load %arg3[%c0_3, %c0_4] : memref<60x1xf32, #tpu.memory_space<vmem>>, vector<60x1xf32>
    %5 = vector.broadcast %4 : vector<60x1xf32> to vector<60x128xf32>
    %6 = arith.addf %3, %5 : vector<60x128xf32>
    %7 = math.tanh %6 : vector<60x128xf32>
    %c0_5 = arith.constant 0 : index
    %c0_6 = arith.constant 0 : index
    %8 = vector.load %arg4[%c0_5, %c0_6] : memref<210x60xbf16, #tpu.memory_space<vmem>>, vector<210x60xbf16>
    %9 = arith.truncf %7 : vector<60x128xf32> to vector<60x128xbf16>
    %cst_7 = arith.constant dense<0.000000e+00> : vector<210x128xf32>
    %10 = tpu.matmul %8, %9, %cst_7 {dimension_numbers = #tpu.dot_dimension_numbers<[1], [0], [0], [1], [0, 0, 1, 1], [], []>} : vector<210x60xbf16>, vector<60x128xbf16>, vector<210x128xf32> -> vector<210x128xf32>
    %c0_8 = arith.constant 0 : index
    %c0_9 = arith.constant 0 : index
    %11 = vector.load %arg5[%c0_8, %c0_9] : memref<210x1xf32, #tpu.memory_space<vmem>>, vector<210x1xf32>
    %12 = vector.broadcast %11 : vector<210x1xf32> to vector<210x128xf32>
    %13 = arith.addf %10, %12 : vector<210x128xf32>
    %14 = math.tanh %13 : vector<210x128xf32>
    %c0_10 = arith.constant 0 : index
    %c0_11 = arith.constant 0 : index
    %15 = vector.load %arg6[%c0_10, %c0_11] : memref<210x1xf32, #tpu.memory_space<vmem>>, vector<210x1xf32>
    %16 = vector.broadcast %15 : vector<210x1xf32> to vector<210x128xf32>
    %17 = arith.mulf %16, %14 : vector<210x128xf32>
    %cst_12 = arith.constant dense<0.000000e+00> : vector<128xf32>
    %18 = vector.multi_reduction <add>, %17, %cst_12 [0] : vector<210x128xf32> to vector<128xf32>
    %19 = vector.shape_cast %18 : vector<128xf32> to vector<1x128xf32>
    %c0_13 = arith.constant 0 : index
    %c0_14 = arith.constant 0 : index
    %20 = vector.load %arg7[%c0_13, %c0_14] : memref<1x1xf32, #tpu.memory_space<vmem>>, vector<1x1xf32>
    %21 = vector.broadcast %20 : vector<1x1xf32> to vector<1x128xf32>
    %22 = arith.addf %19, %21 : vector<1x128xf32>
    %c0_15 = arith.constant 0 : index
    %c0_16 = arith.constant 0 : index
    %23 = vector.load %arg8[%c0_15, %c0_16] : memref<1x128xf32, #tpu.memory_space<vmem>>, vector<1x128xf32>
    tpu.vector_store %arg8[%c0_15, %c0_16], %22 {strides = array<i32>} : memref<1x128xf32, #tpu.memory_space<vmem>>, vector<1x128xf32>,
    return
  }
  func.func @transform_0(%arg0: i32) -> (i32, i32) {
    %c0_i32 = arith.constant 0 : i32
    %c0_i32_0 = arith.constant 0 : i32
    return %c0_i32, %arg0 : i32, i32
  }
  func.func @transform_1(%arg0: i32) -> (i32, i32) {
    %c0_i32 = arith.constant 0 : i32
    %c0_i32_0 = arith.constant 0 : i32
    %c0_i32_1 = arith.constant 0 : i32
    return %c0_i32, %c0_i32_0 : i32, i32
  }
  func.func @transform_2(%arg0: i32) -> (i32, i32) {
    %c0_i32 = arith.constant 0 : i32
    %c0_i32_0 = arith.constant 0 : i32
    %c0_i32_1 = arith.constant 0 : i32
    return %c0_i32, %c0_i32_0 : i32, i32
  }
  func.func @transform_3(%arg0: i32) -> (i32, i32) {
    %c0_i32 = arith.constant 0 : i32
    %c0_i32_0 = arith.constant 0 : i32
    %c0_i32_1 = arith.constant 0 : i32
    return %c0_i32, %c0_i32_0 : i32, i32
  }
  func.func @transform_4(%arg0: i32) -> (i32, i32) {
    %c0_i32 = arith.constant 0 : i32
    %c0_i32_0 = arith.constant 0 : i32
    %c0_i32_1 = arith.constant 0 : i32
    return %c0_i32, %c0_i32_0 : i32, i32
  }
  func.func @transform_5(%arg0: i32) -> (i32, i32) {
    %c0_i32 = arith.constant 0 : i32
    %c0_i32_0 = arith.constant 0 : i32
    %c0_i32_1 = arith.constant 0 : i32
    return %c0_i32, %c0_i32_0 : i32, i32
  }
  func.func @transform_6(%arg0: i32) -> (i32, i32) {
    %c0_i32 = arith.constant 0 : i32
    %c0_i32_0 = arith.constant 0 : i32
    %c0_i32_1 = arith.constant 0 : i32
    return %c0_i32, %c0_i32_0 : i32, i32
  }
  func.func @transform_7(%arg0: i32) -> (i32, i32) {
    %c0_i32 = arith.constant 0 : i32
    %c0_i32_0 = arith.constant 0 : i32
    return %c0_i32, %arg0 : i32, i32
  }
}

</mosaic_0001>

<bundles_post_ra>
// kernel: l3_forward.1
= control target key start
LH: loop header
LB: loop body
LE: loop exit
PB: predicated region body
PF: predicated region fallthrough
CT: control target
= control target key end

     0   :  { %vm120_vm0 = vcmask 1040384   ;;  %vm121_vm1 = vcmask 1041408   ;;  %v1124_v0 = vmov 0   ;;  %v1125_v4 = vmov 65535   ;;  %s1558_s2 = inlined_call_operand.vmem [shape: f32[60,1], index: 2, kind: input, shape index: {}]   ;;  %s1559_s0 = inlined_call_operand.vmem [shape: f32[3,128], index: 0, kind: input, shape index: {}]   ;;  %s1560_s1 = inlined_call_operand.vmem [shape: bf16[60,3], index: 1, kind: input, shape index: {}]   ;;  %s1561_s6 = inlined_call_operand.<no memory space> [shape: f32[1,1], index: 6, kind: input, shape index: {}]   ;;  %s1562_s4 = inlined_call_operand.vmem [shape: f32[210,1], index: 4, kind: input, shape index: {}]   ;;  %s1563_s5 = inlined_call_operand.vmem [shape: f32[210,1], index: 5, kind: input, shape index: {}]   ;;  %s1564_s3 = inlined_call_operand.vmem [shape: bf16[210,60], index: 3, kind: input, shape index: {}]   ;;  %s1565_s7 = inlined_call_operand.vmem [shape: f32[1,128], index: 7, kind: output, shape index: {}]  }
   0x1   :  { %1035 = vset.pattern.permute.xlu1 %v1124_v0  ;;  %1034 = vset.pattern.permute.xlu0 %v1124_v0  ;;  %v45_v1 = vld [vmem:[%s1558_s2 + $0x30] sm:$0xff]  ;;  %v43_v2 = vld [vmem:[%s1558_s2 + $0x20] sm:$0xff]  ;;  %v46_v3 = vld [vmem:[%s1558_s2 + $0x38] sm:$0xf]  ;;  %v122_v5 = vsel %vm120_vm0, 4294967295, %v1125_v4  ;;  %v12_v6 = vstv %s1561_s6  ;;  %vm107_vm2 = vcmask 23552  }
   0x2   :  { %79 = vperm.xlu0 %1034, %v45_v1   ;;  %69 = vperm.xlu1 %1035, %v43_v2   ;;  %v29_v7 = vld [vmem:[%s1559_s0] sm:$0x7]  ;;  %v123_v8 = vsel %vm121_vm1, %v122_v5, 0  ;;  %13 = vst [vmem:[#allocation2] sm:$0x1] %v12_v6  ;;  %v44_v9 = vld [vmem:[%s1558_s2 + $0x28] sm:$0xff] }
   0x3   :  { %v30_v10 = vpack.c.bf16 %v29_v7, %v29_v7  ;;  %v1036_v11 = vld [vmem:[%s1560_s1] sm:$0xff]   ;;  %v42_v13 = vld [vmem:[%s1558_s2 + $0x18] sm:$0xff]  ;;  %v41_v14 = vld [vmem:[%s1558_s2 + $0x10] sm:$0xff]  ;;  %vm461_vm3 = vcmask 490496   ;;  %vm504_vm4 = vcmask 1045504  }
   0x4   :  { %978 = vmatprep.mubr.msk.bf16.mxu0 %vm107_vm2, %v1036_v11  ;;  %v1037_v15 = vld [vmem:[%s1560_s1 + $0x8] sm:$0xff]   ;;  %v1038_v16 = vld [vmem:[%s1560_s1 + $0x10] sm:$0xff]   ;;  %v39_v18 = vld [vmem:[%s1558_s2] sm:$0xff] }
   0x5   :  { %v125_v12 = vand.u32 %v123_v8, %v30_v10  ;;  %v40_v17 = vld [vmem:[%s1558_s2 + $0x8] sm:$0xff]  ;;  %v231_v20 = vld [vmem:[%s1562_s4] sm:$0xff]  ;;  %v1039_v21 = vld [vmem:[%s1560_s1 + $0x18] sm:$0x3f]  }
   0x6   :  { %84 = vperm.xlu0 %1034, %v46_v3   ;;  %74 = vperm.xlu1 %1035, %v44_v9   ;;  %v232_v19 = vld [vmem:[%s1562_s4 + $0x8] sm:$0xff]  ;;  %v234_v22 = vld [vmem:[%s1562_s4 + $0x18] sm:$0xff]  ;;  %v233_v23 = vld [vmem:[%s1562_s4 + $0x10] sm:$0xff] }
   0x7   :  { %976 = vmatprep.subr.bf16.mxu0 %v125_v12  ;;  %v236_v24 = vld [vmem:[%s1562_s4 + $0x28] sm:$0xff]  ;;  %v235_v25 = vld [vmem:[%s1562_s4 + $0x20] sm:$0xff]  ;;  %v238_v26 = vld [vmem:[%s1562_s4 + $0x38] sm:$0xff] }
   0x8   :  { %977 = vmatpush3.bf16.msra.mxu0 %v125_v12  ;;  %v237_v27 = vld [vmem:[%s1562_s4 + $0x30] sm:$0xff]  ;;  %v240_v28 = vld [vmem:[%s1562_s4 + $0x48] sm:$0xff]  ;;  %v239_v29 = vld [vmem:[%s1562_s4 + $0x40] sm:$0xff] }
   0x9   :  { %v242_v30 = vld [vmem:[%s1562_s4 + $0x58] sm:$0xff]  ;;  %v241_v31 = vld [vmem:[%s1562_s4 + $0x50] sm:$0xff]  ;;  %v244_v32 = vld [vmem:[%s1562_s4 + $0x68] sm:$0xff] }
   0xa   :  { %64 = vperm.xlu1 %1035, %v42_v13   ;;  %59 = vperm.xlu0 %1034, %v41_v14   ;;  %v243_v33 = vld [vmem:[%s1562_s4 + $0x60] sm:$0xff]  ;;  %v246_v34 = vld [vmem:[%s1562_s4 + $0x78] sm:$0xff]  ;;  %v245_v35 = vld [vmem:[%s1562_s4 + $0x70] sm:$0xff] }
   0xb   :  { %979 = vmatmul.mubr.msk.bf16.vlgmr.msra.gmra.mxu0 %vm107_vm2, %v1037_v15  ;;  %v248_v36 = vld [vmem:[%s1562_s4 + $0x88] sm:$0xff]  ;;  %v247_v37 = vld [vmem:[%s1562_s4 + $0x80] sm:$0xff]  ;;  %v250_v38 = vld [vmem:[%s1562_s4 + $0x98] sm:$0xff] }
   0xc   :  { %982 = vmatprep.mubr.msk.bf16.mxu0 %vm107_vm2, %v1038_v16  ;;  %v249_v39 = vld [vmem:[%s1562_s4 + $0x90] sm:$0xff]  ;;  %v252_v40 = vld [vmem:[%s1562_s4 + $0xa8] sm:$0xff]  ;;  %v251_v41 = vld [vmem:[%s1562_s4 + $0xa0] sm:$0xff] }
   0xd   :  { %v679_v42 = vld [vmem:[%s1563_s5] sm:$0xff]  ;;  %v253_v43 = vld [vmem:[%s1562_s4 + $0xb0] sm:$0xff]  ;;  %v680_v45 = vld [vmem:[%s1563_s5 + $0x8] sm:$0xff] }
   0xe   :  { %54 = vperm.xlu1 %1035, %v40_v17   ;;  %49 = vperm.xlu0 %1034, %v39_v18   ;;  %v681_v44 = vld [vmem:[%s1563_s5 + $0x10] sm:$0xff]  ;;  %v683_v46 = vld [vmem:[%s1563_s5 + $0x20] sm:$0xff]  ;;  %v682_v47 = vld [vmem:[%s1563_s5 + $0x18] sm:$0xff] }
   0xf   :  { %v685_v48 = vld [vmem:[%s1563_s5 + $0x30] sm:$0xff]  ;;  %v684_v49 = vld [vmem:[%s1563_s5 + $0x28] sm:$0xff]  ;;  %v687_v50 = vld [vmem:[%s1563_s5 + $0x40] sm:$0xff] }
  0x10   :  { %v686_v51 = vld [vmem:[%s1563_s5 + $0x38] sm:$0xff]  ;;  %v689_v52 = vld [vmem:[%s1563_s5 + $0x50] sm:$0xff]  ;;  %v688_v53 = vld [vmem:[%s1563_s5 + $0x48] sm:$0xff] }
  0x11   :  { %v691_v54 = vld [vmem:[%s1563_s5 + $0x60] sm:$0xff]  ;;  %v690_v55 = vld [vmem:[%s1563_s5 + $0x58] sm:$0xff]  ;;  %v693_v56 = vld [vmem:[%s1563_s5 + $0x70] sm:$0xff] }
  0x12   :  { %265 = vperm.xlu1 %1035, %v232_v19   ;;  %260 = vperm.xlu0 %1034, %v231_v20   ;;  %v692_v57 = vld [vmem:[%s1563_s5 + $0x68] sm:$0xff]  ;;  %v694_v58 = vld [vmem:[%s1563_s5 + $0x78] sm:$0xff]  ;;  %v695_v60 = vld [vmem:[%s1563_s5 + $0x80] sm:$0xff] }
  0x13   :  { %983 = vmatmul.mubr.msk.bf16.gmra.mxu0 %vm107_vm2, %v1039_v21  ;;  %v254_v59 = vld [vmem:[%s1562_s4 + $0xb8] sm:$0xff]  ;;  %v255_v61 = vld [vmem:[%s1562_s4 + $0xc0] sm:$0xff]  ;;  %v696_v62 = vld [vmem:[%s1563_s5 + $0x88] sm:$0xff] }
  0x14   :  { %v256_v63 = vld [vmem:[%s1562_s4 + $0xc8] sm:$0xff]  ;;  %v697_v0 = vld [vmem:[%s1563_s5 + $0x90] sm:$0xff]  ;;  %v699_v2 = vld [vmem:[%s1563_s5 + $0xa0] sm:$0xff] }
  0x15   :  { %v257_v1 = vld [vmem:[%s1562_s4 + $0xd0] sm:$0x3]  ;;  %v698_v3 = vld [vmem:[%s1563_s5 + $0x98] sm:$0xff]  ;;  %v700_v5 = vld [vmem:[%s1563_s5 + $0xa8] sm:$0xff] }
  0x16   :  { %275 = vperm.xlu1 %1035, %v234_v22   ;;  %270 = vperm.xlu0 %1034, %v233_v23   ;;  %v701_v4 = vld [vmem:[%s1563_s5 + $0xb0] sm:$0xff]  ;;  %v703_v6 = vld [vmem:[%s1563_s5 + $0xc0] sm:$0xff]  ;;  %v702_v7 = vld [vmem:[%s1563_s5 + $0xb8] sm:$0xff] }
  0x17   :  { %v705_v8 = vld [vmem:[%s1563_s5 + $0xd0] sm:$0x3]  ;;  %v704_v9 = vld [vmem:[%s1563_s5 + $0xc8] sm:$0xff]  ;;  %v1040_v10 = vld [vmem:[%s1564_s3] sm:$0xff]  }
  0x18   :  { %v1041_v11 = vld [vmem:[%s1564_s3 + $0x30] sm:$0xff]   ;;  %994 = vmatprep.mubr.msk.bf16.mxu0 %vm461_vm3, %v1040_v10  ;;  %v901_v12 = vld [vmem:[#allocation2] sm:$0x1] }
  0x19   :  { %1006 = vmatprep.mubr.msk.bf16.mxu1 %vm461_vm3, %v1041_v11 }
  0x1a   :  { %285 = vperm.xlu1 %1035, %v236_v24   ;;  %280 = vperm.xlu0 %1034, %v235_v25  }
  0x1e   :  { %295 = vperm.xlu1 %1035, %v238_v26   ;;  %290 = vperm.xlu0 %1034, %v237_v27  }
  0x22   :  { %305 = vperm.xlu1 %1035, %v240_v28   ;;  %300 = vperm.xlu0 %1034, %v239_v29  }
  0x26   :  { %315 = vperm.xlu1 %1035, %v242_v30   ;;  %310 = vperm.xlu0 %1034, %v241_v31  }
  0x2a   :  { %325 = vperm.xlu1 %1035, %v244_v32   ;;  %320 = vperm.xlu0 %1034, %v243_v33  }
  0x2e   :  { %335 = vperm.xlu1 %1035, %v246_v34   ;;  %330 = vperm.xlu0 %1034, %v245_v35  }
  0x32   :  { %345 = vperm.xlu1 %1035, %v248_v36   ;;  %340 = vperm.xlu0 %1034, %v247_v37  }
  0x36   :  { %355 = vperm.xlu1 %1035, %v250_v38   ;;  %350 = vperm.xlu0 %1034, %v249_v39  }
  0x3a   :  { %365 = vperm.xlu1 %1035, %v252_v40   ;;  %360 = vperm.xlu0 %1034, %v251_v41  }
  0x3e   :  { %708 = vperm.xlu1 %1035, %v679_v42   ;;  %370 = vperm.xlu0 %1034, %v253_v43  }
  0x42   :  { %718 = vperm.xlu1 %1035, %v681_v44   ;;  %713 = vperm.xlu0 %1034, %v680_v45  }
  0x46   :  { %728 = vperm.xlu1 %1035, %v683_v46   ;;  %723 = vperm.xlu0 %1034, %v682_v47  }
  0x4a   :  { %738 = vperm.xlu1 %1035, %v685_v48   ;;  %733 = vperm.xlu0 %1034, %v684_v49  }
  0x4e   :  { %748 = vperm.xlu1 %1035, %v687_v50   ;;  %743 = vperm.xlu0 %1034, %v686_v51   ;;  %v1042_v50 = vld [vmem:[%s1564_s3 + $0x8] sm:$0xff]   ;;  %v1043_v51 = vld [vmem:[%s1564_s3 + $0x38] sm:$0xff]  }
  0x52   :  { %758 = vperm.xlu1 %1035, %v689_v52   ;;  %753 = vperm.xlu0 %1034, %v688_v53   ;;  %v1044_v52 = vld [vmem:[%s1564_s3 + $0x10] sm:$0xff]   ;;  %v1045_v53 = vld [vmem:[%s1564_s3 + $0x40] sm:$0xff]  }
  0x56   :  { %768 = vperm.xlu1 %1035, %v691_v54   ;;  %763 = vperm.xlu0 %1034, %v690_v55   ;;  %v1046_v54 = vld [vmem:[%s1564_s3 + $0x18] sm:$0xff]   ;;  %v1047_v55 = vld [vmem:[%s1564_s3 + $0x48] sm:$0xff]  }
  0x5a   :  { %778 = vperm.xlu1 %1035, %v693_v56   ;;  %773 = vperm.xlu0 %1034, %v692_v57   ;;  %v1048_v56 = vld [vmem:[%s1564_s3 + $0x20] sm:$0xff]   ;;  %v1049_v57 = vld [vmem:[%s1564_s3 + $0x50] sm:$0xff]  }
  0x5e   :  { %783 = vperm.xlu1 %1035, %v694_v58   ;;  %375 = vperm.xlu0 %1034, %v254_v59   ;;  %v1050_v58 = vld [vmem:[%s1564_s3 + $0x28] sm:$0xff]   ;;  %v1051_v59 = vld [vmem:[%s1564_s3 + $0x58] sm:$0xff]  }
  0x62   :  { %788 = vperm.xlu1 %1035, %v695_v60   ;;  %380 = vperm.xlu0 %1034, %v255_v61   ;;  %v1052_v60 = vld [vmem:[%s1564_s3 + $0x60] sm:$0xff]   ;;  %v1053_v61 = vld [vmem:[%s1564_s3 + $0x68] ss:$0 sps:$4 sm:$0x11]  }
  0x66   :  { %793 = vperm.xlu1 %1035, %v696_v62   ;;  %385 = vperm.xlu0 %1034, %v256_v63  }
  0x6a   :  { %798 = vperm.xlu1 %1035, %v697_v0   ;;  %390 = vperm.xlu0 %1034, %v257_v1  }
  0x6e   :  { %808 = vperm.xlu1 %1035, %v699_v2   ;;  %803 = vperm.xlu0 %1034, %v698_v3  }
  0x72   :  { %818 = vperm.xlu1 %1035, %v701_v4   ;;  %813 = vperm.xlu0 %1034, %v700_v5  }
  0x76   :  { %828 = vperm.xlu1 %1035, %v703_v6   ;;  %823 = vperm.xlu0 %1034, %v702_v7  }
  0x7a   :  { %838 = vperm.xlu1 %1035, %v705_v8   ;;  %833 = vperm.xlu0 %1034, %v704_v9  }
  0x7d   :  { %v70_v13 = vpop.permute.xlu1 %69  ;;  %v80_v15 = vpop.permute.xlu0 %79 }
  0x7e   :  { %904 = vperm.xlu0 %1034, %v901_v12  }
  0x81   :  { %v75_v18 = vpop.permute.xlu1 %74  ;;  %v85_v20 = vpop.permute.xlu0 %84 }
  0x85   :  { %v65_v24 = vpop.permute.xlu1 %64  ;;  %v60_v28 = vpop.permute.xlu0 %59 }
  0x89   :  { %v55_v33 = vpop.permute.xlu1 %54  ;;  %v50_v35 = vpop.permute.xlu0 %49 }
  0x8d   :  { %v266_v62 = vpop.permute.xlu1 %265  ;;  %v261_v63 = vpop.permute.xlu0 %260 }
  0x91   :  { %v276_v0 = vpop.permute.xlu1 %275  ;;  %v271_v1 = vpop.permute.xlu0 %270 }
  0x95   :  { %v286_v2 = vpop.permute.xlu1 %285  ;;  %v281_v3 = vpop.permute.xlu0 %280 }
  0x99   :  { %v296_v4 = vpop.permute.xlu1 %295  ;;  %v291_v5 = vpop.permute.xlu0 %290 }
  0x9d   :  { %v1431_v6 = vpop.permute.xlu1 %305  ;;  %v1433_v7 = vpop.permute.xlu0 %300 }
  0xa1   :  { %v1435_v8 = vpop.permute.xlu1 %315  ;;  %v1437_v9 = vpop.permute.xlu0 %310 }
  0xa5   :  { %v1439_v10 = vpop.permute.xlu1 %325  ;;  %v1441_v11 = vpop.permute.xlu0 %320 }
  0xa9   :  { %v1443_v12 = vpop.permute.xlu1 %335 }
  0xcb   :  { %v980_v14 = vpop.f32.mrf.mxu0 }
  0xcc   :  { %v170_v32 = vadd.f32 %v980_v14, %v60_v28  ;;  %v1447_v14 = vpop.permute.xlu1 %345 }
  0xcd   :  { %v161_v16 = vpop.f32.mrf.mxu0 }
  0xce   :  { %v162_v36 = vadd.f32 %v161_v16, %v50_v35 }
  0xcf   :  { %v981_v17 = vpop.f32.mrf.mxu0 }
  0xd0   :  { %v173_v30 = vadd.f32 %v981_v17, %v65_v24  ;;  %v1451_v16 = vpop.permute.xlu1 %355 }
  0xd1   :  { %v164_v19 = vpop.f32.mrf.mxu0 }
  0xd2   :  { %v165_v34 = vadd.f32 %v164_v19, %v55_v33 }
  0xd3   :  { %v984_v21 = vpop.f32.mrf.mxu0 }
  0xd4   :  { %v186_v22 = vadd.f32 %v984_v21, %v80_v15 }
  0xd5   :  { %v177_v23 = vpop.f32.mrf.mxu0 }
  0xd6   :  { %v178_v25 = vadd.f32 %v177_v23, %v70_v13  ;;  %1054 = vtanh.f32 %v186_v22  ;;  %v1445_v13 = vpop.permute.xlu0 %330 }
  0xd7   :  { %v985_v26 = vpop.f32.mrf.mxu0 }
  0xd8   :  { %v189_v27 = vadd.f32 %v985_v26, %v85_v20 }
  0xd9   :  { %v180_v29 = vpop.f32.mrf.mxu0 }
  0xda   :  { %1056 = vtanh.f32 %v189_v27  ;;  %v181_v31 = vadd.f32 %v180_v29, %v75_v18  ;;  %v1449_v15 = vpop.permute.xlu0 %340  ;;  %v1455_v18 = vpop.permute.xlu1 %365 }
  0xdb   :  { %1058 = vtanh.f32 %v178_v25 }
  0xdc   :  { %1060 = vtanh.f32 %v181_v31 }
  0xdd   :  { %1062 = vtanh.f32 %v173_v30 }
  0xde   :  { %1064 = vtanh.f32 %v170_v32  ;;  %v1453_v17 = vpop.permute.xlu0 %350  ;;  %v709_v20 = vpop.permute.xlu1 %708 }
  0xdf   :  { %1066 = vtanh.f32 %v165_v34 }
  0xe0   :  { %1068 = vtanh.f32 %v162_v36 }
  0xe2   :  { %v1457_v19 = vpop.permute.xlu0 %360  ;;  %v1461_v22 = vpop.permute.xlu1 %718 }
  0xe3   :  { %v1055_v37 = vpop.eup %1054 }
  0xe6   :  { %v1459_v21 = vpop.permute.xlu0 %370  ;;  %v1463_v24 = vpop.permute.xlu1 %728 }
  0xe7   :  { %v1057_v38 = vpop.eup %1056 }
  0xe8   :  { %v1059_v39 = vpop.eup %1058  ;;  %v230_v40 = vpack.c.bf16 %v1057_v38, %v1055_v37 }
  0xe9   :  { %v1061_v41 = vpop.eup %1060 }
  0xea   :  { %1030 = vmatprep.subr.msk.bf16.mxu0 %vm504_vm4, %v230_v40  ;;  %1031 = vmatprep.subr.msk.bf16.mxu1 %vm504_vm4, %v230_v40  ;;  %v506_v42 = vsel %vm504_vm4, %v230_v40, 0  ;;  %v229_v43 = vpack.c.bf16 %v1061_v41, %v1059_v39  ;;  %v1063_v44 = vpop.eup %1062  ;;  %v714_v23 = vpop.permute.xlu0 %713 }
  0xeb   :  { %987 = vmatpush3.bf16.msra.mxu0 %v506_v42  ;;  %1026 = vmatpush3.bf16.msra.mxu1 %v506_v42  ;;  %v1065_v45 = vpop.eup %1064  ;;  %v1467_v26 = vpop.permute.xlu1 %738 }
  0xec   :  { %988 = vmatprep.subr.bf16.mxu0 %v229_v43  ;;  %1023 = vmatprep.subr.bf16.mxu1 %v229_v43  ;;  %v228_v46 = vpack.c.bf16 %v1063_v44, %v1065_v45  ;;  %v1067_v47 = vpop.eup %1066 }
  0xed   :  { %v1069_v48 = vpop.eup %1068 }
  0xee   :  { %v227_v49 = vpack.c.bf16 %v1067_v47, %v1069_v48  ;;  %v1465_v25 = vpop.permute.xlu0 %723 }
  0xef   :  { %989 = vmatpush3.bf16.msra.mxu0 %v229_v43  ;;  %1027 = vmatpush3.bf16.msra.mxu1 %v229_v43  ;;  %v1473_v32 = vpop.permute.xlu1 %748 }
  0xf0   :  { %990 = vmatprep.subr.bf16.mxu0 %v228_v46  ;;  %1024 = vmatprep.subr.bf16.mxu1 %v228_v46 }
  0xf2   :  { %v1469_v27 = vpop.permute.xlu0 %733 }
  0xf3   :  { %991 = vmatpush3.bf16.msra.mxu0 %v228_v46  ;;  %1028 = vmatpush3.bf16.msra.mxu1 %v228_v46  ;;  %v1481_v44 = vpop.permute.xlu1 %758 }
  0xf4   :  { %992 = vmatprep.subr.bf16.mxu0 %v227_v49  ;;  %1025 = vmatprep.subr.bf16.mxu1 %v227_v49 }
  0xf6   :  { %v1475_v33 = vpop.permute.xlu0 %743 }
  0xf7   :  { %993 = vmatpush3.bf16.msra.mxu0 %v227_v49  ;;  %1029 = vmatpush3.bf16.msra.mxu1 %v227_v49 }
  0xfa   :  { %995 = vmatmul.mubr.msk.bf16.vlgmr.msra.gmra.mxu0 %vm461_vm3, %v1042_v50  ;;  %1007 = vmatmul.mubr.msk.bf16.vlgmr.msra.gmra.mxu1 %vm461_vm3, %v1043_v51  ;;  %v1483_v45 = vpop.permute.xlu0 %753 }
  0xfb   :  { %998 = vmatprep.mubr.msk.bf16.mxu0 %vm461_vm3, %v1044_v52  ;;  %1010 = vmatprep.mubr.msk.bf16.mxu1 %vm461_vm3, %v1045_v53 }
 0x102   :  { %999 = vmatmul.mubr.msk.bf16.gmra.mxu0 %vm461_vm3, %v1046_v54  ;;  %1011 = vmatmul.mubr.msk.bf16.gmra.mxu1 %vm461_vm3, %v1047_v55  ;;  %v1491_v54 = vpop.permute.xlu1 %768  ;;  %v1493_v55 = vpop.permute.xlu0 %763 }
 0x103   :  { %1002 = vmatprep.mubr.msk.bf16.mxu0 %vm461_vm3, %v1048_v56  ;;  %1014 = vmatprep.mubr.msk.bf16.mxu1 %vm461_vm3, %v1049_v57 }
 0x10a   :  { %1003 = vmatmul.mubr.msk.bf16.gmra.mxu0 %vm461_vm3, %v1050_v58  ;;  %1015 = vmatmul.mubr.msk.bf16.gmra.mxu1 %vm461_vm3, %v1051_v59 }
 0x10b   :  { %1018 = vmatprep.mubr.msk.bf16.mxu1 %vm461_vm3, %v1052_v60 }
 0x112   :  { %1019 = vmatmul.mubr.msk.bf16.gmra.mxu1 %vm461_vm3, %v1053_v61 }
 0x1ba   :  { %v996_v28 = vpop.f32.mrf.mxu0  ;;  %v1471_v29 = vpop.f32.mrf.mxu1 }
 0x1bb   :  { %v551_v35 = vadd.f32 %v996_v28, %v271_v1 }
 0x1bc   :  { %v542_v30 = vpop.f32.mrf.mxu0  ;;  %v590_v31 = vpop.f32.mrf.mxu1 }
 0x1bd   :  { %v543_v34 = vadd.f32 %v542_v30, %v261_v63 }
 0x1be   :  { %v997_v36 = vpop.f32.mrf.mxu0  ;;  %v1477_v37 = vpop.f32.mrf.mxu1 }
 0x1bf   :  { %1070 = vtanh.f32 %v543_v34  ;;  %v554_v40 = vadd.f32 %v997_v36, %v276_v0 }
 0x1c0   :  { %v545_v38 = vpop.f32.mrf.mxu0  ;;  %v593_v39 = vpop.f32.mrf.mxu1  ;;  %1072 = vtanh.f32 %v551_v35 }
 0x1c1   :  { %v546_v41 = vadd.f32 %v545_v38, %v266_v62 }
 0x1c2   :  { %v1000_v42 = vpop.f32.mrf.mxu0  ;;  %v1479_v43 = vpop.f32.mrf.mxu1 }
 0x1c3   :  { %1074 = vtanh.f32 %v546_v41  ;;  %v567_v49 = vadd.f32 %v1000_v42, %v291_v5  ;;  %v591_v42 = vadd.f32 %v590_v31, %v1441_v11 }
 0x1c4   :  { %v558_v46 = vpop.f32.mrf.mxu0  ;;  %v1485_v47 = vpop.f32.mrf.mxu1  ;;  %1076 = vtanh.f32 %v554_v40 }
 0x1c5   :  { %v559_v48 = vadd.f32 %v558_v46, %v281_v3 }
 0x1c6   :  { %v1001_v50 = vpop.f32.mrf.mxu0  ;;  %v1487_v51 = vpop.f32.mrf.mxu1 }
 0x1c7   :  { %1078 = vtanh.f32 %v559_v48  ;;  %v570_v56 = vadd.f32 %v1001_v50, %v296_v4  ;;  %v1503_v4 = vpop.permute.xlu1 %778 }
 0x1c8   :  { %v561_v52 = vpop.f32.mrf.mxu0  ;;  %v1489_v53 = vpop.f32.mrf.mxu1  ;;  %1080 = vtanh.f32 %v567_v49 }
 0x1c9   :  { %v562_v57 = vadd.f32 %v561_v52, %v286_v2  ;;  %v1505_v2 = vpop.permute.xlu0 %773 }
 0x1ca   :  { %v1004_v58 = vpop.f32.mrf.mxu0  ;;  %v1495_v59 = vpop.f32.mrf.mxu1 }
 0x1cb   :  { %1082 = vtanh.f32 %v562_v57  ;;  %v583_v0 = vadd.f32 %v1004_v58, %v1437_v9  ;;  %v1517_v50 = vpop.permute.xlu1 %783  ;;  %v602_v58 = vadd.f32 %v1477_v37, %v1443_v12  ;;  %v610_v12 = vadd.f32 %v1489_v53, %v1447_v14 }
 0x1cc   :  { %v574_v60 = vpop.f32.mrf.mxu0  ;;  %v1497_v61 = vpop.f32.mrf.mxu1  ;;  %1084 = vtanh.f32 %v570_v56 }
 0x1cd   :  { %v575_v62 = vadd.f32 %v574_v60, %v1433_v7  ;;  %v1071_v63 = vpop.eup %1070 }
 0x1ce   :  { %v1005_v1 = vpop.f32.mrf.mxu0  ;;  %v1501_v3 = vpop.f32.mrf.mxu1  ;;  %v841_v35 = vmul.f32 %v1071_v63, %v709_v20 }
 0x1cf   :  { %v1073_v5 = vpop.eup %1072  ;;  %1086 = vtanh.f32 %v575_v62  ;;  %v586_v7 = vadd.f32 %v1005_v1, %v1435_v8 }
 0x1d0   :  { %v1075_v28 = vpop.eup %1074  ;;  %v577_v30 = vpop.f32.mrf.mxu0  ;;  %1088 = vtanh.f32 %v583_v0  ;;  %v843_v41 = vmul.f32 %v1073_v5, %v1461_v22  ;;  %v599_v22 = vadd.f32 %v1471_v29, %v1445_v13  ;;  %v607_v13 = vadd.f32 %v1485_v47, %v1449_v15 }
 0x1d1   :  { %v1507_v34 = vpop.f32.mrf.mxu1  ;;  %v842_v36 = vmul.f32 %v1075_v28, %v714_v23  ;;  %v578_v38 = vadd.f32 %v577_v30, %v1431_v6  ;;  %v1077_v9 = vpop.eup %1076  ;;  %v594_v6 = vadd.f32 %v593_v39, %v1439_v10  ;;  %v618_v47 = vadd.f32 %v1487_v51, %v1451_v16 }
 0x1d2   :  { %v844_v20 = vmul.f32 %v1077_v9, %v1465_v25  ;;  %v376_v23 = vpop.permute.xlu0 %375  ;;  %v789_v39 = vpop.permute.xlu1 %788  ;;  %v626_v16 = vadd.f32 %v1507_v34, %v1455_v18  ;;  %v631_v9 = vadd.f32 %v1495_v59, %v1459_v21 }
 0x1d3   :  { %v1511_v40 = vpop.f32.mrf.mxu1  ;;  %v868_v46 = vadd.f32 %v842_v36, %v841_v35  ;;  %1090 = vtanh.f32 %v578_v38 }
 0x1d4   :  { %v1079_v48 = vpop.eup %1078  ;;  %1092 = vtanh.f32 %v586_v7 }
 0x1d5   :  { %v1515_v49 = vpop.f32.mrf.mxu1  ;;  %v869_v8 = vadd.f32 %v868_v46, %v843_v41  ;;  %v1081_v56 = vpop.eup %1080  ;;  %1094 = vtanh.f32 %v591_v42  ;;  %v845_v11 = vmul.f32 %v1079_v48, %v1463_v24  ;;  %v634_v42 = vadd.f32 %v1501_v3, %v376_v23 }
 0x1d6   :  { %1096 = vtanh.f32 %v594_v6  ;;  %v847_v62 = vmul.f32 %v1081_v56, %v1467_v26  ;;  %v381_v24 = vpop.permute.xlu0 %380  ;;  %v794_v15 = vpop.permute.xlu1 %793 }
 0x1d7   :  { %v1021_v52 = vpop.f32.mrf.mxu1  ;;  %v870_v31 = vadd.f32 %v869_v8, %v844_v20  ;;  %1098 = vtanh.f32 %v599_v22 }
 0x1d8   :  { %v1083_v57 = vpop.eup %1082  ;;  %1100 = vtanh.f32 %v602_v58 }
 0x1d9   :  { %v871_v25 = vadd.f32 %v870_v31, %v845_v11  ;;  %v846_v60 = vmul.f32 %v1083_v57, %v1469_v27  ;;  %v1085_v10 = vpop.eup %1084  ;;  %v615_v27 = vadd.f32 %v1479_v43, %v1453_v17  ;;  %1102 = vtanh.f32 %v607_v13  ;;  %v641_v48 = vpop.f32.mrf.mxu1 }
 0x1da   :  { %v848_v0 = vmul.f32 %v1085_v10, %v1475_v33  ;;  %1104 = vtanh.f32 %v610_v12  ;;  %v386_v36 = vpop.permute.xlu0 %385  ;;  %v623_v17 = vadd.f32 %v1497_v61, %v1457_v19  ;;  %v799_v38 = vpop.permute.xlu1 %798 }
 0x1db   :  { %v872_v29 = vadd.f32 %v871_v25, %v846_v60  ;;  %1106 = vtanh.f32 %v615_v27  ;;  %v642_v6 = vadd.f32 %v641_v48, %v386_v36 }
 0x1dc   :  { %v1087_v63 = vpop.eup %1086  ;;  %1108 = vtanh.f32 %v618_v47 }
 0x1dd   :  { %v873_v1 = vadd.f32 %v872_v29, %v847_v62  ;;  %v1089_v37 = vpop.eup %1088  ;;  %v849_v26 = vmul.f32 %v1087_v63, %v1473_v32  ;;  %1110 = vtanh.f32 %v623_v17 }
 0x1de   :  { %v851_v14 = vmul.f32 %v1089_v37, %v1481_v44  ;;  %v391_v19 = vpop.permute.xlu0 %390  ;;  %1112 = vtanh.f32 %v626_v16  ;;  %v809_v59 = vpop.permute.xlu1 %808 }
 0x1df   :  { %v874_v5 = vadd.f32 %v873_v1, %v848_v0  ;;  %1114 = vtanh.f32 %v631_v9  ;;  %v647_v21 = vadd.f32 %v1511_v40, %v391_v19 }
 0x1e0   :  { %v1091_v28 = vpop.eup %1090  ;;  %1116 = vtanh.f32 %v634_v42 }
 0x1e1   :  { %v875_v30 = vadd.f32 %v874_v5, %v849_v26  ;;  %v850_v33 = vmul.f32 %v1091_v28, %v1483_v45  ;;  %v1093_v35 = vpop.eup %1092 }
 0x1e2   :  { %v1095_v32 = vpop.eup %1094  ;;  %v852_v53 = vmul.f32 %v1093_v35, %v1493_v55  ;;  %v804_v23 = vpop.permute.xlu0 %803 }
 0x1e3   :  { %v876_v43 = vadd.f32 %v875_v30, %v850_v33  ;;  %v1097_v51 = vpop.eup %1096  ;;  %v853_v45 = vmul.f32 %v1095_v32, %v1491_v54  ;;  %v639_v54 = vadd.f32 %v1515_v49, %v381_v24  ;;  %v819_v31 = vpop.permute.xlu1 %818 }
 0x1e4   :  { %v1099_v41 = vpop.eup %1098  ;;  %v854_v61 = vmul.f32 %v1097_v51, %v1505_v2 }
 0x1e5   :  { %v877_v7 = vadd.f32 %v876_v43, %v851_v14  ;;  %v1101_v46 = vpop.eup %1100  ;;  %v855_v18 = vmul.f32 %v1099_v41, %v1503_v4  ;;  %1118 = vtanh.f32 %v639_v54 }
 0x1e6   :  { %v1103_v20 = vpop.eup %1102  ;;  %v856_v8 = vmul.f32 %v1101_v46, %v1517_v50  ;;  %1120 = vtanh.f32 %v647_v21  ;;  %v814_v25 = vpop.permute.xlu0 %813 }
 0x1e7   :  { %v878_v44 = vadd.f32 %v877_v7, %v852_v53  ;;  %v1105_v3 = vpop.eup %1104  ;;  %v857_v52 = vmul.f32 %v1103_v20, %v789_v39  ;;  %1122 = vtanh.f32 %v642_v6  ;;  %v829_v39 = vpop.permute.xlu1 %828  ;;  %v907_v53 = vlaneseq }
 0x1e8   :  { %v1107_v22 = vpop.eup %1106  ;;  %v858_v4 = vmul.f32 %v1105_v3, %v794_v15 }
 0x1e9   :  { %v879_v55 = vadd.f32 %v878_v44, %v853_v45  ;;  %v1109_v49 = vpop.eup %1108  ;;  %v859_v57 = vmul.f32 %v1107_v22, %v799_v38  ;;  %v908_v51 = vshrl.u32 %v907_v53, 7 }
 0x1ea   :  { %v1111_v58 = vpop.eup %1110  ;;  %v860_v50 = vmul.f32 %v1109_v49, %v804_v23  ;;  %v824_v1 = vpop.permute.xlu0 %823 }
 0x1eb   :  { %v880_v34 = vadd.f32 %v879_v55, %v854_v61  ;;  %v1113_v10 = vpop.eup %1112  ;;  %v861_v62 = vmul.f32 %v1111_v58, %v809_v59  ;;  %v839_v47 = vpop.permute.xlu1 %838  ;;  %v909_v9 = vsub.s32 0, %v908_v51 }
 0x1ec   :  { %v1115_v29 = vpop.eup %1114  ;;  %v862_v63 = vmul.f32 %v1113_v10, %v814_v25 }
 0x1ed   :  { %v881_v2 = vadd.f32 %v880_v34, %v855_v18  ;;  %v1117_v0 = vpop.eup %1116  ;;  %v863_v12 = vmul.f32 %v1115_v29, %v819_v31 }
 0x1ee   :  { %v864_v5 = vmul.f32 %v1117_v0, %v824_v1  ;;  %v834_v35 = vpop.permute.xlu0 %833 }
 0x1ef   :  { %v882_v56 = vadd.f32 %v881_v2, %v856_v8 }
 0x1f1   :  { %v883_v11 = vadd.f32 %v882_v56, %v857_v52 }
 0x1f2   :  { %v1119_v27 = vpop.eup %1118  ;;  %v905_v41 = vpop.permute.xlu0 %904 }
 0x1f3   :  { %v884_v40 = vadd.f32 %v883_v11, %v858_v4  ;;  %v1121_v26 = vpop.eup %1120  ;;  %v865_v30 = vmul.f32 %v1119_v27, %v829_v39  ;;  %v910_v61 = vrot.slane %v905_v41, %v909_v9 }
 0x1f4   :  { %v1123_v15 = vpop.eup %1122  ;;  %v867_v36 = vmul.f32 %v1121_v26, %v839_v47 }
 0x1f5   :  { %v885_v60 = vadd.f32 %v884_v40, %v859_v57  ;;  %v866_v17 = vmul.f32 %v1123_v15, %v834_v35 }
 0x1f6   :  { %v893_v32 = vsel %vm121_vm1, %v867_v36, 0.0 }
 0x1f7   :  { %v886_v13 = vadd.f32 %v885_v60, %v860_v50 }
 0x1f9   :  { %v887_v24 = vadd.f32 %v886_v13, %v861_v62 }
 0x1fb   :  { %v888_v37 = vadd.f32 %v887_v24, %v862_v63 }
 0x1fd   :  { %v889_v28 = vadd.f32 %v888_v37, %v863_v12 }
 0x1ff   :  { %v890_v33 = vadd.f32 %v889_v28, %v864_v5 }
 0x201   :  { %v891_v14 = vadd.f32 %v890_v33, %v865_v30 }
 0x203   :  { %v892_v43 = vadd.f32 %v891_v14, %v866_v17 }
 0x205   :  { %v894_v7 = vadd.f32 %v893_v32, %v892_v43 }
 0x207   :  { %v895_v16 = vrot.slane %v894_v7, 4 }
 0x209   :  { %v896_v38 = vadd.f32 %v895_v16, %v894_v7 }
 0x20b   :  { %v897_v45 = vrot.slane %v896_v38, 2 }
 0x20d   :  { %v898_v44 = vadd.f32 %v897_v45, %v896_v38 }
 0x20f   :  { %v899_v19 = vrot.slane %v898_v44, 1 }
 0x211   :  { %v900_v42 = vadd.f32 %v899_v19, %v898_v44 }
 0x213   :  { %v911_v55 = vadd.f32 %v910_v61, %v900_v42 }
 0x215   :  { %912 = vst [vmem:[%s1565_s7] sm:$0x1] %v911_v55 }

</bundles_post_ra>
